<compile_context>
chip_gen: v6e
topology: v6e:2x2x1
jax: 0.10.0
libtpu: 0.0.40
codegen_flags: <defaults>
</compile_context>

<pallas_src>
import functools
import math

import jax
import jax.numpy as jnp
from jax.experimental import pallas as pl
from jax.experimental.pallas import tpu as pltpu


def _round_up(n: int, m: int) -> int:
    return ((n + m - 1) // m) * m


def _rmsnorm_kernel(x_ref, scale_ref, o_ref, *, partial_size, slab, eps):
    # x_ref: (block_rows, d), scale_ref: (1, d), o_ref: (block_rows, d)
    x = x_ref[...].astype(jnp.float32)

    # Partial L2 norm over the first `partial_size` features. Only the first
    # `slab` lanes (lane-aligned superset of partial_size) enter the reduce,
    # so the mask/square/reduce touches slab/d of the row instead of all of it.
    head = x[:, :slab]
    if slab != partial_size:
        lane = jax.lax.broadcasted_iota(jnp.int32, head.shape, dimension=1)
        head = jnp.where(lane < partial_size, head, 0.0)
    ss = jnp.sum(head * head, axis=-1, keepdims=True)      # (block_rows, 1)
    rms = jnp.sqrt(ss) * (float(partial_size) ** -0.5)     # ||x_part|| / sqrt(d_x)
    # Exact reciprocal (approx=True EUP path may exceed the 1e-5 tolerance).
    inv = pl.reciprocal(rms + eps, approx=False)

    scale = scale_ref[...].astype(jnp.float32)              # (1, d), bcast over rows
    o_ref[...] = ((x * inv) * scale).astype(o_ref.dtype)


def _choose_block_rows(rows: int, d: int, itemsize: int) -> int:
    """Largest sensible row tile for this memory-bound kernel."""
    # Target ~4 MiB per block -> ~16-18 MiB with double-buffered in+out,
    # which fits the default scoped VMEM on v5e/v6e/v7x.
    target_block_bytes = 4 * 1024 * 1024
    br = max(8, target_block_bytes // (d * itemsize))
    br = min(br, 2048)
    if rows <= 8:
        return rows                      # full-extent leading block
    br = min(br, _round_up(rows, 8))
    # Prefer at least 2 grid steps so both v7x TensorCores (megacore
    # "parallel" axis) have work; neutral on single-TC v5e/v6e.
    half = max(8, _round_up(pl.cdiv(rows, 2), 8))
    br = min(br, half)
    return max(8, (br // 8) * 8)


def rmsnorm(x, scale, *, p=0.00625, eps=1e-9, block_rows=None):
    """Partial RMSNorm matching the PyTorch RMSNorm.forward (bias=False).

    x: (..., d) array; scale: (d,) array.
    """
    d = x.shape[-1]
    if p < 0.0 or p > 1.0:
        partial_size = d
    else:
        partial_size = int(d * p)
    assert 0 < partial_size <= d, "partial_size must be >= 1"
    slab = min(d, _round_up(partial_size, 128))   # lane-aligned reduce width

    lead_shape = x.shape[:-1]
    rows = int(math.prod(lead_shape)) if lead_shape else 1
    x2 = x.reshape(rows, d)
    scale2 = scale.reshape(1, d)

    itemsize = jnp.dtype(x.dtype).itemsize
    if block_rows is None:
        block_rows = _choose_block_rows(rows, d, itemsize)
    block_rows = max(1, min(block_rows, rows))
    grid = (pl.cdiv(rows, block_rows),)           # tail rows masked by Pallas

    kernel = functools.partial(
        _rmsnorm_kernel, partial_size=partial_size, slab=slab, eps=eps
    )

    cost = pl.CostEstimate(
        flops=3 * rows * d,
        transcendentals=0,
        bytes_accessed=2 * rows * d * itemsize + d * itemsize,
    )

    out2 = pl.pallas_call(
        kernel,
        out_shape=jax.ShapeDtypeStruct((rows, d), x.dtype),
        grid_spec=pltpu.PrefetchScalarGridSpec(
            num_scalar_prefetch=0,
            grid=grid,
            in_specs=[
                pl.BlockSpec((block_rows, d), lambda i: (i, 0)),
                pl.BlockSpec((1, d), lambda i: (0, 0)),
            ],
            out_specs=pl.BlockSpec((block_rows, d), lambda i: (i, 0)),
        ),
        compiler_params=pltpu.CompilerParams(
            dimension_semantics=("parallel",),
            vmem_limit_bytes=32 * 1024 * 1024,
        ),
        cost_estimate=cost,
    )(x2, scale2)

    return out2.reshape(*lead_shape, d)


def rmsnorm_ref(x, scale, *, p=0.00625, eps=1e-9):
    d = x.shape[-1]
    partial_size = int(d * p)
    partial_x = x[..., :partial_size]
    norm_x = jnp.sqrt(jnp.sum(partial_x * partial_x, axis=-1, keepdims=True))
    rms_x = norm_x * (float(partial_size) ** -0.5)
    return scale * (x / (rms_x + eps))


if __name__ == "__main__":
    key = jax.random.PRNGKey(0)
    batch, seq, d = 2, 8, 512          # int(512 * 0.00625) = 3 -> partial_size = 3

    kx, _ = jax.random.split(key)
    x = jax.random.normal(kx, (batch, seq, d), dtype=jnp.float32)
    # Deterministic parameter init mirroring nn.Parameter(torch.ones(d)).
    scale = jnp.ones((d,), dtype=jnp.float32)

    out = rmsnorm(x, scale)
    out = jax.block_until_ready(out)

    ref = rmsnorm_ref(x, scale)
    assert out.shape == x.shape and out.dtype == x.dtype
    assert jnp.allclose(out, ref, atol=1e-5, rtol=1e-5), "mismatch vs reference"

    print("KERNEL_OK")
</pallas_src>

<mosaic_0001>
module attributes {stable_mosaic.version = 11 : i64} {
  func.func @_rmsnorm_kernel(%arg0: i32, %arg1: memref<8x512xf32, #tpu.memory_space<vmem>>, %arg2: memref<1x512xf32, #tpu.memory_space<vmem>>, %arg3: memref<8x512xf32, #tpu.memory_space<vmem>>) attributes {dimension_semantics = [#tpu.dimension_semantics<parallel>], iteration_bounds = array<i64: 2>, scalar_prefetch = 0 : i64, scratch_operands = 0 : i64, tpu.core_type = #tpu.core_type<tc>, window_params = [{transform_indices = @transform_0, window_bounds = array<i64: 8, 512>}, {pipeline_mode = #tpu.pipeline_mode<synchronous>, transform_indices = @transform_1, window_bounds = array<i64: 1, 512>}, {transform_indices = @transform_2, window_bounds = array<i64: 8, 512>}]} {
    %c0 = arith.constant 0 : index
    %c0_0 = arith.constant 0 : index
    %0 = vector.load %arg1[%c0, %c0_0] : memref<8x512xf32, #tpu.memory_space<vmem>>, vector<8x512xf32>
    %1 = vector.extract_strided_slice %0 {offsets = [0, 0], sizes = [8, 128], strides = [1, 1]} : vector<8x512xf32> to vector<8x128xf32>
    %2 = tpu.iota {dimensions = array<i32: 1>} : vector<8x128xi32>
    %c3_i32 = arith.constant 3 : i32
    %3 = vector.broadcast %c3_i32 : i32 to vector<8x128xi32>
    %4 = arith.cmpi slt, %2, %3 : vector<8x128xi32>
    %cst = arith.constant 0.000000e+00 : f32
    %5 = vector.broadcast %cst : f32 to vector<8x128xf32>
    %6 = arith.select %4, %1, %5 : vector<8x128xi1>, vector<8x128xf32>
    %7 = arith.mulf %6, %6 : vector<8x128xf32>
    %cst_1 = arith.constant dense<0.000000e+00> : vector<8xf32>
    %8 = vector.multi_reduction <add>, %7, %cst_1 [1] : vector<8x128xf32> to vector<8xf32>
    %9 = vector.shape_cast %8 : vector<8xf32> to vector<8x1xf32>
    %10 = math.sqrt %9 : vector<8x1xf32>
    %cst_2 = arith.constant 0.577350259 : f32
    %11 = vector.broadcast %cst_2 : f32 to vector<8x1xf32>
    %12 = arith.mulf %10, %11 : vector<8x1xf32>
    %cst_3 = arith.constant 9.99999971E-10 : f32
    %13 = vector.broadcast %cst_3 : f32 to vector<8x1xf32>
    %14 = arith.addf %12, %13 : vector<8x1xf32>
    %15 = tpu.reciprocal %14 : vector<8x1xf32> -> vector<8x1xf32>
    %c0_4 = arith.constant 0 : index
    %c0_5 = arith.constant 0 : index
    %16 = vector.load %arg2[%c0_4, %c0_5] : memref<1x512xf32, #tpu.memory_space<vmem>>, vector<1x512xf32>
    %17 = vector.broadcast %15 : vector<8x1xf32> to vector<8x512xf32>
    %18 = arith.mulf %0, %17 : vector<8x512xf32>
    %19 = vector.broadcast %16 : vector<1x512xf32> to vector<8x512xf32>
    %20 = arith.mulf %18, %19 : vector<8x512xf32>
    %c0_6 = arith.constant 0 : index
    %c0_7 = arith.constant 0 : index
    %21 = vector.load %arg3[%c0_6, %c0_7] : memref<8x512xf32, #tpu.memory_space<vmem>>, vector<8x512xf32>
    tpu.vector_store %arg3[%c0_6, %c0_7], %20 {strides = array<i32>} : memref<8x512xf32, #tpu.memory_space<vmem>>, vector<8x512xf32>,
    return
  }
  func.func @transform_0(%arg0: i32) -> (i32, i32) {
    %c0_i32 = arith.constant 0 : i32
    %c0_i32_0 = arith.constant 0 : i32
    return %arg0, %c0_i32 : i32, i32
  }
  func.func @transform_1(%arg0: i32) -> (i32, i32) {
    %c0_i32 = arith.constant 0 : i32
    %c0_i32_0 = arith.constant 0 : i32
    %c0_i32_1 = arith.constant 0 : i32
    return %c0_i32, %c0_i32_0 : i32, i32
  }
  func.func @transform_2(%arg0: i32) -> (i32, i32) {
    %c0_i32 = arith.constant 0 : i32
    %c0_i32_0 = arith.constant 0 : i32
    return %arg0, %c0_i32 : i32, i32
  }
}

</mosaic_0001>

<bundles_post_ra>
// kernel: tpu_custom_call.1
= control target key start
LH: loop header
LB: loop body
LE: loop exit
PB: predicated region body
PF: predicated region fallthrough
CT: control target
= control target key end

     0   :  { %7 = vsyncpa [#allocation3], 0  ;;  %s732_s0 = inlined_call_operand.hbm [shape: f32[16,512], index: 0, kind: input, shape index: {}]   ;;  %s733_s1 = inlined_call_operand.hbm [shape: f32[1,512], index: 1, kind: input, shape index: {}]   ;;  %s734_s2 = inlined_call_operand.hbm [shape: f32[16,512], index: 2, kind: output, shape index: {}]  }
   0x1   :  { %9 = vsyncpa [#allocation3 + $0x1], 0 }
   0x2   :  { %10 = vsyncpa [#allocation6], 0 }
   0x3   :  { %11 = vsyncpa [#allocation4], 0 }
   0x4   :  { %13 = vsyncpa [#allocation4 + $0x1], 0  ;;  %s544_s9 = smov 0   ;;  %s546_s10 = smov 0  }
   0x5   :  { %s548_s11 = smov 0   ;;  %s550_s12 = smov 0  }
   0x6 LB: > { %s565_s13 = sadd.s32 4294967295, %s524_s12   ;;  %s323_s14 = sadd.s32 4294967294, %s524_s12   ;;  %s524_s12 = sphi %s550_s12, %s757_s12   ;;  %s520_s11 = sphi %s548_s11, %s756_s11   ;;  %s516_s10 = sphi %s546_s10, %s755_s10   ;;  %s512_s9 = sphi %s544_s9, %s754_s9  }
   0x7   : > { %p39_p0 = scmp.ne.s32.totalorder %s516_s10, %s512_s9  ;;  %p735_p1 = scmp.eq.s32.totalorder %s565_s13, 0 }
   0x8   : > { %p90_p3 = scmp.eq.s32.totalorder %s323_s14, 1  ;;  %p324_p5 = scmp.ge.s32.totalorder %s524_s12, 1 }
   0x9   : > { %p574_p4 = por %p735_p1, %p39_p0  ;;  %p97_p7 = scmp.lt.s32.totalorder %s524_s12, 3 }
   0xa   : > { %p579_p6 = por %p90_p3, %p39_p0  ;;  %s526_s18 = smov [#allocation5]  }
   0xb   : > { %s739_s15 = scalar_select %p574_p4, 1, 0 }
   0xc   : > { %s740_s16 = scalar_select %p579_p6, 1, 0 }
   0xd   : > { %p584_p8 = pnand %p324_p5, %p97_p7  ;;  %s110_s19 = sshll.u32 %s526_s18, 4  ;;  %s111_s19 = int_to_ptr.vmem [resolvable:$true] %s110_s19 }
   0xe   : > { %s592_s20 = sadd.s32 1, %s524_s12   ;;  %s26_s24 = sadd.s32 1, %s520_s11 }
   0xf   : > { %s741_s17 = scalar_select %p584_p8, 1, 0 }
  0x10   : > { %p349_p10 = pneg %p584_p8  ;;  %s23_s22 = ssub.s32 %s524_s12, %s592_s20 }
  0x11   : > { %p602_p12 = scmp.eq.s32.totalorder %s23_s22, 0  ;;  %p33_p13 = scmp.ne.s32.totalorder %s520_s11, %s516_s10 }
  0x12   : > { %p596_p11 = pnand %p349_p10, %p735_p1  ;;  %s413_s25 = scalar_lea.vmem %s111_s19, 64 }
  0x13   : > { %p414_p3 = scmp.ne.s32.totalorder %s111_s19, %s413_s25  ;;  %p421_p9 = scmp.lt.s32.totalorder %s111_s19, %s111_s19 }
  0x14   : > { %p404_p0 = pneg %p596_p11  ;;  %p422_p2 = scmp.lt.s32.totalorder %s413_s25, %s413_s25 }
  0x16   : > { %p416_p5 = pnand %p414_p3, %p404_p0  ;;  %p423_p10 = por %p422_p2, %p421_p9 }
  0x18   : > { %p417_p7 = pneg %p416_p5 }
  0x1a   : > { %p424_p1 = pnand %p423_p10, %p417_p7 }
  0x1c   : > { %427 = shalt.err (!%p424_p1)
}
  0x1d   : > { %352 = dma.hbm_to_vmem [thread:$0]  (!%p596_p11), %s733_s1, 64, %s111_s19, [#allocation6]  }
  0x1e   : > { %s619_s28 = scalar_select %p602_p12, %s520_s11, %s26_s24  }
  0x1f   : > { %p34_p1 = scmp.eq.s32.totalorder %s524_s12, 0  ;;  %p744_p2 = scmp.eq.s32.totalorder %s565_s13, 1 }
  0x20   : > { %p362_p0 = scmp.lt.s32.totalorder %s524_s12, 2  ;;  %s121_s30 = sand.u32 1, %s520_s11  }
  0x21   : > { %p627_p9 = por %p744_p2, %p33_p13  ;;  %p35_p3 = por %p34_p1, %p33_p13 }
  0x22   : > { %s327_s3 = sshll.u32 %s121_s30, 5  ;;  %s339_s4 = sshll.u32 %s524_s12, 9 }
  0x23   : > { %s745_s29 = scalar_select %p627_p9, 1, 0 }
  0x24   : > { %s640_s7 = scalar_lea.hbm %s732_s0, %s339_s4  ;;  %s125_s8 = scalar_lea.vmem [#allocation2], %s327_s3 }
  0x25   : > { %s133_s14 = sshll.u32 %s125_s8, 4  ;;  %p642_p11 = pnand %p362_p0, %p35_p3  ;;  %s134_s14 = int_to_ptr.vmem [resolvable:$true] %s133_s14 }
  0x26   : > { %s122_s19 = scalar_lea.sflag [#allocation3], %s121_s30  ;;  %s428_s21 = scalar_lea.hbm %s640_s7, 512 }
  0x27   : > { %p429_p12 = scmp.ne.s32.totalorder %s640_s7, %s428_s21  ;;  %p430_p13 = pneg %p642_p11 }
  0x28   : > { %s433_s24 = scalar_lea.hbm %s732_s0, 1024  ;;  %p434_p10 = scmp.lt.s32.totalorder %s640_s7, %s732_s0 }
  0x29   : > { %p431_p5 = pnand %p430_p13, %p429_p12  ;;  %p435_p1 = scmp.lt.s32.totalorder %s433_s24, %s428_s21 }
  0x2b   : > { %p432_p7 = pneg %p431_p5  ;;  %p436_p2 = por %p435_p1, %p434_p10 }
  0x2d   : > { %p437_p0 = pnand %p436_p2, %p432_p7 }
  0x2f   : > { %440 = shalt.err (!%p437_p0)
}
  0x30   : > { %s441_s27 = scalar_lea.vmem %s134_s14, 512  ;;  %s527_s30 = smov [#allocation2]  }
  0x31   : > { %p442_p3 = scmp.ne.s32.totalorder %s134_s14, %s441_s27  ;;  %s446_s3 = sshll.u32 %s527_s30, 4  ;;  %s447_s3 = int_to_ptr.vmem [resolvable:$false] %s446_s3 }
  0x32   : > { %s448_s4 = scalar_lea.vmem %s447_s3, 1024  ;;  %p449_p12 = scmp.lt.s32.totalorder %s134_s14, %s447_s3 }
  0x33   : > { %p444_p6 = pnand %p442_p3, %p430_p13  ;;  %p450_p5 = scmp.lt.s32.totalorder %s448_s4, %s441_s27 }
  0x35   : > { %p445_p9 = pneg %p444_p6  ;;  %p451_p4 = por %p450_p5, %p449_p12 }
  0x37   : > { %p452_p8 = pnand %p451_p4, %p445_p9 }
  0x39   : > { %455 = shalt.err (!%p452_p8)
}
  0x3a   : > { %356 = dma.hbm_to_vmem [thread:$0]  (!%p642_p11), %s640_s7, 512, %s134_s14, %s122_s19  }
  0x3b   : > { %p747_p7 = scmp.ne.s32.totalorder %s741_s17, 0 }
  0x3c   : > { %s663_s5 = sand.u32 (!%p747_p7), 1, %s516_s10   ;;  %p748_p4 = scmp.ne.s32.totalorder (!%p747_p7), %s739_s15, 0 }
  0x3d   : > { %142 = sbr.rel (%p747_p7) target bundleno = 270 (0x10e), region = 28  ;;  %s331_s6 = sshll.u32 (!%p747_p7), %s663_s5, 5 }
  0x3e   : > { %s145_s8 = scalar_lea.sflag (!%p747_p7), [#allocation3], %s663_s5  ;;  %s669_s21 = scalar_lea.vmem (!%p747_p7), [#allocation2], %s331_s6 }
  0x42   : > { %499 = dma.done.wait (%p748_p4), %s145_s8, 512  }
  0x43   : > { %501 = vsyncadd (%p748_p4), %s145_s8, 4294966784  ;;  %p749_p6 = scmp.eq.s32.totalorder %s565_s13, 0 }
  0x45   : > { %503 = dma.done.wait (%p749_p6), [#allocation6], 64   ;;  %p750_p8 = pmov %p749_p6 }
  0x46   : > { %v177_v0 = vlaneseq  ;;  %v173_v2 = vld [vmem:[%s669_s21] sm:$0xff]  ;;  %v174_v19 = vld [vmem:[%s669_s21 + $0x8] sm:$0xff]  ;;  %v175_v20 = vld [vmem:[%s669_s21 + $0x10] sm:$0xff]  ;;  %s340_s15 = sshll.u32 %s565_s13, 9  ;;  %s172_s17 = scalar_lea.vmem [#allocation7], %s331_s6 }
  0x47   : > { %505 = vsyncadd (%p750_p8), [#allocation6], 4294967232  ;;  %v194_v18 = vld [vmem:[#allocation5] sm:$0xf]  ;;  %v176_v21 = vld [vmem:[%s669_s21 + $0x18] sm:$0xff]  ;;  %s243_s7 = sshll.u32 %s172_s17, 4  ;;  %s689_s19 = scalar_lea.hbm %s734_s2, %s340_s15  ;;  %s691_s7 = int_to_ptr.vmem [resolvable:$true] %s243_s7 }
  0x48   : > { %v178_v1 = vand.u32 127, %v177_v0  ;;  %v201_v13 = vshrl.u32 %v177_v0, 7  ;;  %s229_s13 = scalar_lea.sflag [#allocation4], %s663_s5  ;;  %s456_s22 = scalar_lea.vmem %s691_s7, 512 }
  0x49   : > { %p457_p9 = scmp.ne.s32.totalorder %s691_s7, %s456_s22  ;;  %p751_p11 = scmp.ne.s32.totalorder %s745_s29, 0 }
  0x4a   : > { %vm179_vm0 = vcmp.lt.s32.totalorder %v178_v1, 3  ;;  %v202_v14 = vsub.s32 0, %v201_v13  ;;  %v206_v15 = vsub.s32 1, %v201_v13  ;;  %v210_v16 = vsub.s32 2, %v201_v13  ;;  %s528_s23 = smov [#allocation7]  }
  0x4b   : > { %v180_v3 = vsel %vm179_vm0, %v173_v2, 0.0  ;;  %v214_v17 = vsub.s32 3, %v201_v13  ;;  %p458_p13 = pnand %p457_p9, %p751_p11  ;;  %s460_s24 = sshll.u32 %s528_s23, 4  ;;  %s461_s24 = int_to_ptr.vmem [resolvable:$false] %s460_s24 }
  0x4c   : > { %v181_v4 = vmul.f32 %v180_v3, %v180_v3  ;;  %v203_v22 = vrot.slane %v194_v18, %v202_v14  ;;  %v207_v23 = vrot.slane %v194_v18, %v206_v15  ;;  %v211_v24 = vrot.slane %v194_v18, %v210_v16  ;;  %s462_s25 = scalar_lea.vmem %s461_s24, 1024  ;;  %p463_p1 = scmp.lt.s32.totalorder %s691_s7, %s461_s24 }
  0x4d   : > { %v215_v25 = vrot.slane %v194_v18, %v214_v17  ;;  %p459_p10 = pneg %p458_p13  ;;  %p464_p2 = scmp.lt.s32.totalorder %s462_s25, %s456_s22 }
  0x4e   : > { %182 = vadd.xlane.f32.xlu0 %v181_v4 }
  0x4f   : > { %p465_p0 = por %p464_p2, %p463_p1 }
  0x51   : > { %p466_p3 = pnand %p465_p0, %p459_p10 }
  0xd7   : > { %v183_v5 = vpop.xlane.xlu0 %182 }
  0xd8   : > { %398 = vrsqrt.f32 %v183_v5  ;;  %vm186_vm1 = vcmp.eq.f32.partialorder %v183_v5, inf  ;;  %v189_v8 = vand.u32 2147483648, %v183_v5  ;;  %vm188_vm2 = vcmp.eq.f32.partialorder %v183_v5, 0.0 }
  0xe5   : > { %v399_v6 = vpop.eup %398 }
  0xe6   : > { %v185_v7 = vmul.f32 %v399_v6, %v183_v5 }
  0xe8   : > { %v187_v9 = vsel %vm186_vm1, %v183_v5, %v185_v7 }
  0xe9   : > { %v190_v10 = vsel %vm188_vm2, %v189_v8, %v187_v9 }
  0xea   : > { %v191_v11 = vmul.f32 0.57735026, %v190_v10 }
  0xec   : > { %v192_v12 = vadd.f32 1e-09, %v191_v11 }
  0xee   : > { %400 = vrcp.f32 %v192_v12 }
  0xfb   : > { %v401_v26 = vpop.eup %400 }
  0xfc   : > { %v195_v27 = vmul.f32 %v401_v26, %v173_v2  ;;  %v196_v28 = vmul.f32 %v401_v26, %v174_v19  ;;  %v197_v29 = vmul.f32 %v401_v26, %v175_v20  ;;  %v198_v30 = vmul.f32 %v401_v26, %v176_v21 }
  0xfe   : > { %v220_v31 = vmul.f32 %v203_v22, %v195_v27  ;;  %v221_v32 = vmul.f32 %v207_v23, %v196_v28  ;;  %v222_v33 = vmul.f32 %v211_v24, %v197_v29  ;;  %v223_v34 = vmul.f32 %v215_v25, %v198_v30 }
 0x100   : > { %224 = vst [vmem:[%s172_s17] sm:$0xff] %v220_v31  ;;  %225 = vst [vmem:[%s172_s17 + $0x8] sm:$0xff] %v221_v32 }
 0x101   : > { %226 = vst [vmem:[%s172_s17 + $0x10] sm:$0xff] %v222_v33  ;;  %227 = vst [vmem:[%s172_s17 + $0x18] sm:$0xff] %v223_v34 }
 0x102   : > { %469 = shalt.err (!%p466_p3)
}
 0x103   : > { %s470_s26 = scalar_lea.hbm %s689_s19, 512  ;;  %s474_s3 = scalar_lea.hbm %s734_s2, 1024 }
 0x104   : > { %p471_p12 = scmp.ne.s32.totalorder %s689_s19, %s470_s26  ;;  %p475_p4 = scmp.lt.s32.totalorder %s689_s19, %s734_s2 }
 0x105   : > { %p476_p6 = scmp.lt.s32.totalorder %s474_s3, %s470_s26 }
 0x106   : > { %p472_p5 = pnand %p471_p12, %p751_p11 }
 0x107   : > { %p477_p8 = por %p476_p6, %p475_p4 }
 0x108   : > { %p473_p7 = pneg %p472_p5 }
 0x10a   : > { %p478_p9 = pnand %p477_p8, %p473_p7 }
 0x10c   : > { %481 = shalt.err (!%p478_p9)
}
 0x10d   : > { %347 = dma.vmem_to_hbm [thread:$0]  (%p751_p11), %s691_s7, 512, %s689_s19, %s229_s13  }
 0x10e PF: > { %s255_s6 = sand.u32 1, %s512_s9   ;;  %p752_p13 = scmp.ne.s32.totalorder %s740_s16, 0 }
 0x10f   : > { %p753_p10 = scmp.ge.s32.totalorder %s524_s12, 2  ;;  %s256_s8 = scalar_lea.sflag [#allocation4], %s255_s6 }
 0x111   : > { %p358_p1 = pnand %p753_p10, %p752_p13 }
 0x113   : > { %p359_p2 = pneg %p358_p1 }
 0x115   : > { %507 = dma.done.wait (%p359_p2), %s256_s8, 512  }
 0x116   : > { %509 = vsyncadd (%p359_p2), %s256_s8, 4294966784  ;;  %p16_p0 = scmp.ge.s32.totalorder %s592_s20, 4   ;;  %s754_s9 = smov %s516_s10 }
 0x117   : > { %s755_s10 = smov %s520_s11  ;;  %s756_s11 = smov %s619_s28 }
 0x118   : > { %s757_s12 = smov %s592_s20  ;;  %18 = sbr.rel (!%p16_p0) target bundleno = 6 (0x6), region = 77 }
 0x11d   :  { %261 = vsyncpa [#allocation3], 1 }
 0x11e   :  { %263 = vsyncpa [#allocation3 + $0x1], 1 }
 0x11f   :  { %264 = vsyncpa [#allocation6], 1 }
 0x120   :  { %265 = vsyncpa [#allocation4], 1 }
 0x121   :  { %267 = vsyncpa [#allocation4 + $0x1], 1 }

</bundles_post_ra>
